<compile_context>
chip_gen: v7x
topology: tpu7x:2x2x1
jax: 0.10.0
libtpu: 0.0.40
codegen_flags: <defaults>
</compile_context>

<pallas_src>
import jax
import jax.numpy as jnp
from jax.experimental import pallas as pl
from jax.experimental.pallas import tpu as pltpu


def _attn_pool_kernel(x_ref, wq_ref, wkv_ref, bq_ref, bkv_ref,
                      out_ref, attn_ref):
    tb, n, d = x_ref.shape
    x = x_ref[...].astype(jnp.float32)                          # (TB, N, D)
    x2 = x.reshape(tb * n, d)                                   # (TB*N, D)

    # Fused K|V projection: one (TB*N, D) @ (D, 2D) MXU matmul, f32 accum.
    kv = (jnp.dot(x2, wkv_ref[...], preferred_element_type=jnp.float32)
          + bkv_ref[...])                                       # (TB*N, 2D)
    kv = kv.reshape(tb, n, 2 * d)
    keys = kv[..., :d]                                          # (TB, N, D)
    values = kv[..., d:]                                        # (TB, N, D)

    # Per-bag mean -> one batched query projection.  The D**-0.5 scale is
    # already folded into wq/bq.
    mean_x = jnp.mean(x, axis=1)                                # (TB, D)
    query = (jnp.dot(mean_x, wq_ref[...], preferred_element_type=jnp.float32)
             + bq_ref[...])                                     # (TB, D)

    # scores[b, j] = <query_b, keys_{b,j}>  — VPU multiply + XLU lane reduce
    # (a 1-row MXU matmul would just serialize behind the projections).
    scores = jnp.sum(keys * query[:, None, :], axis=-1)         # (TB, N)

    # Exact, numerically stable softmax over the tile axis (lanes).
    scores = scores - jnp.max(scores, axis=-1, keepdims=True)
    e = jnp.exp(scores)
    w = e / jnp.sum(e, axis=-1, keepdims=True)                  # (TB, N)

    # out_b = sum_j w[b, j] * values[b, j]  — VPU multiply + sublane reduce.
    out = jnp.sum(w[:, :, None] * values, axis=1)               # (TB, D)

    out_ref[...] = out.astype(out_ref.dtype)
    attn_ref[...] = w.astype(attn_ref.dtype)


def attention_pool(x, wq, bq, wk, bk, wv, bv, *, bags_per_block=256):
    """Batched attention pooling.

    x: (B, N, D) float32 — B bags of N tile embeddings.
    wq/wk/wv: (D, D) (torch weights transposed, i.e. used as x @ W),
    bq/bk/bv: (D,) or (1, D).
    Returns (out, attn): out (B, D), attn (B, N).
    """
    b, n, d = x.shape
    scale = d ** (-0.5)

    # One-time parameter prep (in production do this once at load time).
    wq_s = (wq * scale).astype(jnp.float32)                      # fold scale
    bq_s = (jnp.reshape(bq, (1, d)) * scale).astype(jnp.float32)
    wkv = jnp.concatenate([wk, wv], axis=1).astype(jnp.float32)  # (D, 2D)
    bkv = jnp.concatenate(
        [jnp.reshape(bk, (1, d)), jnp.reshape(bv, (1, d))], axis=1
    ).astype(jnp.float32)                                        # (1, 2D)

    # Bag tiling: TB == (padded) B for small inputs, otherwise a multiple of 8
    # so the 2-D lane-dense out/attn blocks satisfy the sublane rule.
    if b <= bags_per_block:
        tb, b_pad = b, b
    else:
        tb = max(8, (bags_per_block // 8) * 8)
        b_pad = ((b + tb - 1) // tb) * tb
    x_in = x if b_pad == b else jnp.pad(x, ((0, b_pad - b), (0, 0), (0, 0)))
    grid = (b_pad // tb,)

    # Only raise the scoped-VMEM limit when the (double-buffered) block needs it.
    itemsize = 4
    need = (2 * (tb * n * d + tb * d + tb * n) * itemsize
            + 2 * (3 * d * d + 3 * d) * itemsize + (2 << 20))
    cp_kwargs = dict(dimension_semantics=("parallel",))
    if need > (16 << 20):
        cp_kwargs["vmem_limit_bytes"] = int(min(need, 48 << 20))

    out, attn = pl.pallas_call(
        _attn_pool_kernel,
        out_shape=(
            jax.ShapeDtypeStruct((b_pad, d), jnp.float32),
            jax.ShapeDtypeStruct((b_pad, n), jnp.float32),
        ),
        grid=grid,
        in_specs=[
            pl.BlockSpec((tb, n, d), lambda i: (i, 0, 0)),   # x, per-block
            pl.BlockSpec((d, d), lambda i: (0, 0)),          # Wq (pre-scaled)
            pl.BlockSpec((d, 2 * d), lambda i: (0, 0)),      # [Wk | Wv]
            pl.BlockSpec((1, d), lambda i: (0, 0)),          # bq (pre-scaled)
            pl.BlockSpec((1, 2 * d), lambda i: (0, 0)),      # [bk | bv]
        ],
        out_specs=(
            pl.BlockSpec((tb, d), lambda i: (i, 0)),         # pooled output
            pl.BlockSpec((tb, n), lambda i: (i, 0)),         # attention weights
        ),
        compiler_params=pltpu.CompilerParams(**cp_kwargs),
    )(x_in, wq_s, wkv, bq_s, bkv)

    return out[:b], attn[:b]


def reference(x, wq, bq, wk, bk, wv, bv):
    """Pure-JAX replica of torch AttentionPool.forward for one bag."""
    d = x.shape[-1]
    scale = d ** (-0.5)
    query = jnp.mean(x, axis=0, keepdims=True) @ wq + bq          # (1, D)
    keys = x @ wk + bk                                            # (N, D)
    values = x @ wv + bv                                          # (N, D)
    scores = (query @ keys.T) * scale                             # (1, N)
    wts = jax.nn.softmax(scores, axis=-1)                         # (1, N)
    out = wts @ values                                            # (1, D)
    return out[0], wts[0]


if __name__ == "__main__":
    B, N, D = 4, 8, 32   # 4 bags, 8 tile embeddings each, embedding dim 32

    key = jax.random.PRNGKey(0)
    ks = jax.random.split(key, 7)
    x = jax.random.normal(ks[0], (B, N, D), dtype=jnp.float32)
    # Parameters: torch nn.Linear(D, D) weights, stored transposed for x @ W.
    wq = jax.random.normal(ks[1], (D, D), dtype=jnp.float32) * (D ** -0.5)
    wk = jax.random.normal(ks[2], (D, D), dtype=jnp.float32) * (D ** -0.5)
    wv = jax.random.normal(ks[3], (D, D), dtype=jnp.float32) * (D ** -0.5)
    bq = jax.random.normal(ks[4], (1, D), dtype=jnp.float32) * 0.1
    bk = jax.random.normal(ks[5], (1, D), dtype=jnp.float32) * 0.1
    bv = jax.random.normal(ks[6], (1, D), dtype=jnp.float32) * 0.1

    out, attn = attention_pool(x, wq, bq, wk, bk, wv, bv)
    jax.block_until_ready((out, attn))

    ref_out, ref_attn = jax.vmap(
        lambda xb: reference(xb, wq, bq, wk, bk, wv, bv))(x)

    assert out.shape == (B, D) and attn.shape == (B, N)
    assert jnp.allclose(out, ref_out, atol=1e-4, rtol=1e-4), (out, ref_out)
    assert jnp.allclose(attn, ref_attn, atol=1e-4, rtol=1e-4), (attn, ref_attn)
    # Exact softmax normalization: weights sum to ~1 per bag.
    assert jnp.allclose(attn.sum(axis=-1), 1.0, atol=1e-5)

    print("KERNEL_OK")
</pallas_src>

<mosaic_0001>
module attributes {stable_mosaic.version = 11 : i64} {
  func.func @_attn_pool_kernel(%arg0: i32, %arg1: memref<4x8x32xf32, #tpu.memory_space<vmem>>, %arg2: memref<32x32xf32, #tpu.memory_space<vmem>>, %arg3: memref<32x64xf32, #tpu.memory_space<vmem>>, %arg4: memref<1x32xf32, #tpu.memory_space<vmem>>, %arg5: memref<1x64xf32, #tpu.memory_space<vmem>>, %arg6: memref<4x32xf32, #tpu.memory_space<vmem>>, %arg7: memref<4x8xf32, #tpu.memory_space<vmem>>) attributes {dimension_semantics = [#tpu.dimension_semantics<parallel>], iteration_bounds = array<i64: 1>, scalar_prefetch = 0 : i64, scratch_operands = 0 : i64, tpu.core_type = #tpu.core_type<tc>, window_params = [{transform_indices = @transform_0, window_bounds = array<i64: 4, 8, 32>}, {pipeline_mode = #tpu.pipeline_mode<synchronous>, transform_indices = @transform_1, window_bounds = array<i64: 32, 32>}, {pipeline_mode = #tpu.pipeline_mode<synchronous>, transform_indices = @transform_2, window_bounds = array<i64: 32, 64>}, {pipeline_mode = #tpu.pipeline_mode<synchronous>, transform_indices = @transform_3, window_bounds = array<i64: 1, 32>}, {pipeline_mode = #tpu.pipeline_mode<synchronous>, transform_indices = @transform_4, window_bounds = array<i64: 1, 64>}, {transform_indices = @transform_5, window_bounds = array<i64: 4, 32>}, {transform_indices = @transform_6, window_bounds = array<i64: 4, 8>}]} {
    %c0 = arith.constant 0 : index
    %c0_0 = arith.constant 0 : index
    %c0_1 = arith.constant 0 : index
    %0 = vector.load %arg1[%c0, %c0_0, %c0_1] : memref<4x8x32xf32, #tpu.memory_space<vmem>>, vector<4x8x32xf32>
    %1 = vector.shape_cast %0 : vector<4x8x32xf32> to vector<32x32xf32>
    %c0_2 = arith.constant 0 : index
    %c0_3 = arith.constant 0 : index
    %2 = vector.load %arg3[%c0_2, %c0_3] : memref<32x64xf32, #tpu.memory_space<vmem>>, vector<32x64xf32>
    %cst = arith.constant dense<0.000000e+00> : vector<32x64xf32>
    %3 = tpu.matmul %1, %2, %cst {dimension_numbers = #tpu.dot_dimension_numbers<[1], [0], [0], [1], [0, 0, 1, 1], [], []>} : vector<32x32xf32>, vector<32x64xf32>, vector<32x64xf32> -> vector<32x64xf32>
    %c0_4 = arith.constant 0 : index
    %c0_5 = arith.constant 0 : index
    %4 = vector.load %arg5[%c0_4, %c0_5] : memref<1x64xf32, #tpu.memory_space<vmem>>, vector<1x64xf32>
    %5 = vector.broadcast %4 : vector<1x64xf32> to vector<32x64xf32>
    %6 = arith.addf %3, %5 : vector<32x64xf32>
    %7 = vector.shape_cast %6 : vector<32x64xf32> to vector<4x8x64xf32>
    %8 = vector.extract_strided_slice %7 {offsets = [0, 0, 0], sizes = [4, 8, 32], strides = [1, 1, 1]} : vector<4x8x64xf32> to vector<4x8x32xf32>
    %9 = vector.extract_strided_slice %7 {offsets = [0, 0, 32], sizes = [4, 8, 32], strides = [1, 1, 1]} : vector<4x8x64xf32> to vector<4x8x32xf32>
    %cst_6 = arith.constant dense<0.000000e+00> : vector<4x32xf32>
    %10 = vector.multi_reduction <add>, %0, %cst_6 [1] : vector<4x8x32xf32> to vector<4x32xf32>
    %cst_7 = arith.constant 8.000000e+00 : f32
    %11 = vector.broadcast %cst_7 : f32 to vector<4x32xf32>
    %12 = arith.divf %10, %11 : vector<4x32xf32>
    %c0_8 = arith.constant 0 : index
    %c0_9 = arith.constant 0 : index
    %13 = vector.load %arg2[%c0_8, %c0_9] : memref<32x32xf32, #tpu.memory_space<vmem>>, vector<32x32xf32>
    %cst_10 = arith.constant dense<0.000000e+00> : vector<4x32xf32>
    %14 = tpu.matmul %12, %13, %cst_10 {dimension_numbers = #tpu.dot_dimension_numbers<[1], [0], [0], [1], [0, 0, 1, 1], [], []>} : vector<4x32xf32>, vector<32x32xf32>, vector<4x32xf32> -> vector<4x32xf32>
    %c0_11 = arith.constant 0 : index
    %c0_12 = arith.constant 0 : index
    %15 = vector.load %arg4[%c0_11, %c0_12] : memref<1x32xf32, #tpu.memory_space<vmem>>, vector<1x32xf32>
    %16 = vector.broadcast %15 : vector<1x32xf32> to vector<4x32xf32>
    %17 = arith.addf %14, %16 : vector<4x32xf32>
    %18 = vector.shape_cast %17 : vector<4x32xf32> to vector<4x1x32xf32>
    %19 = vector.broadcast %18 : vector<4x1x32xf32> to vector<4x8x32xf32>
    %20 = arith.mulf %8, %19 : vector<4x8x32xf32>
    %cst_13 = arith.constant dense<0.000000e+00> : vector<4x8xf32>
    %21 = vector.multi_reduction <add>, %20, %cst_13 [2] : vector<4x8x32xf32> to vector<4x8xf32>
    %cst_14 = arith.constant dense<0xFF800000> : vector<4xf32>
    %22 = vector.multi_reduction <maximumf>, %21, %cst_14 [1] : vector<4x8xf32> to vector<4xf32>
    %23 = vector.shape_cast %22 : vector<4xf32> to vector<4x1xf32>
    %24 = vector.broadcast %23 : vector<4x1xf32> to vector<4x8xf32>
    %25 = arith.subf %21, %24 : vector<4x8xf32>
    %26 = math.exp %25 : vector<4x8xf32>
    %cst_15 = arith.constant dense<0.000000e+00> : vector<4xf32>
    %27 = vector.multi_reduction <add>, %26, %cst_15 [1] : vector<4x8xf32> to vector<4xf32>
    %28 = vector.shape_cast %27 : vector<4xf32> to vector<4x1xf32>
    %29 = vector.broadcast %28 : vector<4x1xf32> to vector<4x8xf32>
    %30 = arith.divf %26, %29 : vector<4x8xf32>
    %31 = vector.shape_cast %30 : vector<4x8xf32> to vector<4x8x1xf32>
    %32 = vector.broadcast %31 : vector<4x8x1xf32> to vector<4x8x32xf32>
    %33 = arith.mulf %32, %9 : vector<4x8x32xf32>
    %cst_16 = arith.constant dense<0.000000e+00> : vector<4x32xf32>
    %34 = vector.multi_reduction <add>, %33, %cst_16 [1] : vector<4x8x32xf32> to vector<4x32xf32>
    %c0_17 = arith.constant 0 : index
    %c0_18 = arith.constant 0 : index
    %35 = vector.load %arg6[%c0_17, %c0_18] : memref<4x32xf32, #tpu.memory_space<vmem>>, vector<4x32xf32>
    tpu.vector_store %arg6[%c0_17, %c0_18], %34 {strides = array<i32>} : memref<4x32xf32, #tpu.memory_space<vmem>>, vector<4x32xf32>,
    %c0_19 = arith.constant 0 : index
    %c0_20 = arith.constant 0 : index
    %36 = vector.load %arg7[%c0_19, %c0_20] : memref<4x8xf32, #tpu.memory_space<vmem>>, vector<4x8xf32>
    tpu.vector_store %arg7[%c0_19, %c0_20], %30 {strides = array<i32>} : memref<4x8xf32, #tpu.memory_space<vmem>>, vector<4x8xf32>,
    return
  }
  func.func @transform_0(%arg0: i32) -> (i32, i32, i32) {
    %c0_i32 = arith.constant 0 : i32
    %c0_i32_0 = arith.constant 0 : i32
    %c0_i32_1 = arith.constant 0 : i32
    return %arg0, %c0_i32, %c0_i32_0 : i32, i32, i32
  }
  func.func @transform_1(%arg0: i32) -> (i32, i32) {
    %c0_i32 = arith.constant 0 : i32
    %c0_i32_0 = arith.constant 0 : i32
    %c0_i32_1 = arith.constant 0 : i32
    return %c0_i32, %c0_i32_0 : i32, i32
  }
  func.func @transform_2(%arg0: i32) -> (i32, i32) {
    %c0_i32 = arith.constant 0 : i32
    %c0_i32_0 = arith.constant 0 : i32
    %c0_i32_1 = arith.constant 0 : i32
    return %c0_i32, %c0_i32_0 : i32, i32
  }
  func.func @transform_3(%arg0: i32) -> (i32, i32) {
    %c0_i32 = arith.constant 0 : i32
    %c0_i32_0 = arith.constant 0 : i32
    %c0_i32_1 = arith.constant 0 : i32
    return %c0_i32, %c0_i32_0 : i32, i32
  }
  func.func @transform_4(%arg0: i32) -> (i32, i32) {
    %c0_i32 = arith.constant 0 : i32
    %c0_i32_0 = arith.constant 0 : i32
    %c0_i32_1 = arith.constant 0 : i32
    return %c0_i32, %c0_i32_0 : i32, i32
  }
  func.func @transform_5(%arg0: i32) -> (i32, i32) {
    %c0_i32 = arith.constant 0 : i32
    %c0_i32_0 = arith.constant 0 : i32
    return %arg0, %c0_i32 : i32, i32
  }
  func.func @transform_6(%arg0: i32) -> (i32, i32) {
    %c0_i32 = arith.constant 0 : i32
    %c0_i32_0 = arith.constant 0 : i32
    return %arg0, %c0_i32 : i32, i32
  }
}

</mosaic_0001>

<bundles_post_ra>
// kernel: tpu_custom_call.1
= control target key start
LH: loop header
LB: loop body
LE: loop exit
PB: predicated region body
PF: predicated region fallthrough
CT: control target
= control target key end

     0   :  { %12 = vsyncpa [#allocation3], 0  ;;  %s1031_s0 = inlined_call_operand.hbm [shape: f32[4,8,32], index: 0, kind: input, shape index: {}]   ;;  %s1032_s1 = inlined_call_operand.hbm [shape: f32[32,32], index: 1, kind: input, shape index: {}]   ;;  %s1033_s2 = inlined_call_operand.hbm [shape: f32[32,64], index: 2, kind: input, shape index: {}]   ;;  %s1034_s3 = inlined_call_operand.vmem [shape: f32[1,32], index: 3, kind: input, shape index: {}]   ;;  %s1035_s4 = inlined_call_operand.vmem [shape: f32[1,64], index: 4, kind: input, shape index: {}]   ;;  %s1036_s5 = inlined_call_operand.hbm [shape: f32[4,32], index: 5, kind: output, shape index: {0}]   ;;  %s1037_s6 = inlined_call_operand.hbm [shape: f32[4,8], index: 6, kind: output, shape index: {1}]  }
   0x1   :  { %13 = vsyncpa [#allocation6], 0 }
   0x2   :  { %14 = vsyncpa [#allocation4], 0 }
   0x3   :  { %15 = vsyncpa [#allocation10], 0  ;;  %s820_s21 = smov [#allocation5]   ;;  %s821_s23 = smov [#allocation2]  }
   0x4   :  { %s33_s22 = sshll.u32 %s820_s21, 4  ;;  %s21_s24 = sshll.u32 %s821_s23, 4  ;;  %s34_s22 = int_to_ptr.vmem [resolvable:$true] %s33_s22  ;;  %s868_s24 = int_to_ptr.vmem [resolvable:$true] %s21_s24 }
   0x5   :  { %s702_s27 = scalar_lea.hbm %s1032_s1, 512 }
   0x6   :  { %p703_p0 = scmp.ne.s32.totalorder %s1032_s1, %s702_s27  ;;  %p706_p1 = scmp.lt.u32.totalorder %s702_s27, %s1032_s1 }
   0x8   :  { %p708_p2 = pnand %p706_p1, %p703_p0 }
   0xa   :  { %711 = shalt.err (!%p708_p2)
}
   0xb   :  { %s712_s8 = scalar_lea.vmem %s34_s22, 512  ;;  %p717_p4 = scmp.lt.s32.totalorder %s34_s22, %s34_s22 }
   0xc   :  { %p713_p3 = scmp.ne.s32.totalorder %s34_s22, %s712_s8  ;;  %p718_p5 = scmp.lt.s32.totalorder %s712_s8, %s712_s8 }
   0xe   :  { %p719_p6 = por %p718_p5, %p717_p4 }
  0x10   :  { %p720_p7 = pnand %p719_p6, %p713_p3 }
  0x12   :  { %723 = shalt.err (!%p720_p7)
}
  0x13   :  { %s822_s9 = smov 128   ;;  %s823_s10 = smov 8  }
  0x14   :  { %39 = dma.hbm_to_vmem [thread:$0]  %s1032_s1, 512, %s34_s22, [#allocation6], %s822_s9, %s822_s9, %s823_s10  }
  0x15   :  { %s724_s15 = scalar_lea.hbm %s1031_s0, 512 }
  0x16   :  { %p725_p8 = scmp.ne.s32.totalorder %s1031_s0, %s724_s15  ;;  %p728_p9 = scmp.lt.u32.totalorder %s724_s15, %s1031_s0 }
  0x18   :  { %p730_p10 = pnand %p728_p9, %p725_p8 }
  0x1a   :  { %733 = shalt.err (!%p730_p10)
}
  0x1b   :  { %s734_s20 = scalar_lea.vmem %s868_s24, 512  ;;  %p739_p12 = scmp.lt.s32.totalorder %s868_s24, %s868_s24 }
  0x1c   :  { %p735_p11 = scmp.ne.s32.totalorder %s868_s24, %s734_s20  ;;  %p740_p13 = scmp.lt.s32.totalorder %s734_s20, %s734_s20 }
  0x1e   :  { %p741_p0 = por %p740_p13, %p739_p12 }
  0x20   :  { %p742_p1 = pnand %p741_p0, %p735_p11 }
  0x22   :  { %745 = shalt.err (!%p742_p1)
}
  0x23   :  { %27 = dma.hbm_to_vmem [thread:$0]  %s1031_s0, 512, %s868_s24, [#allocation3], %s822_s9, %s822_s9, %s823_s10  }
  0x24   :  { %s824_s22 = smov [#allocation7]   ;;  %s746_s27 = scalar_lea.hbm %s1033_s2, 512 }
  0x25   :  { %s45_s23 = sshll.u32 %s824_s22, 4  ;;  %p747_p2 = scmp.ne.s32.totalorder %s1033_s2, %s746_s27  ;;  %s46_s23 = int_to_ptr.vmem [resolvable:$true] %s45_s23 }
  0x26   :  { %p750_p3 = scmp.lt.u32.totalorder %s746_s27, %s1033_s2 }
  0x28   :  { %p752_p4 = pnand %p750_p3, %p747_p2 }
  0x2a   :  { %755 = shalt.err (!%p752_p4)
}
  0x2b   :  { %s756_s8 = scalar_lea.vmem %s46_s23, 512  ;;  %p761_p6 = scmp.lt.s32.totalorder %s46_s23, %s46_s23 }
  0x2c   :  { %p757_p5 = scmp.ne.s32.totalorder %s46_s23, %s756_s8  ;;  %p762_p7 = scmp.lt.s32.totalorder %s756_s8, %s756_s8 }
  0x2e   :  { %p763_p8 = por %p762_p7, %p761_p6 }
  0x30   :  { %p764_p9 = pnand %p763_p8, %p757_p5 }
  0x32   :  { %767 = shalt.err (!%p764_p9)
}
  0x33   :  { %51 = dma.hbm_to_vmem [thread:$0]  %s1033_s2, 512, %s46_s23, [#allocation6], %s822_s9, %s822_s9, %s823_s10  }
  0x34   :  { %812 = dma.done.wait [#allocation3], 512  }
  0x35   :  { %813 = vsyncadd [#allocation3], 4294966784 }
  0x36   :  { %814 = dma.done.wait [#allocation6], 1024  }
  0x37   :  { %815 = vsyncadd [#allocation6], 4294966272  ;;  %v825_v0 = vmov 0.0|0.0   ;;  %vm826_vm0 = vmmov 0   ;;  %v827_v1 = vmov 0.0   ;;  %v211_v2 = vld [vmem:[#allocation5] sm:$0xff]  ;;  %v308_v56 = vlaneseq }
  0x38   :  { %665 = vmatprep.subr.bf16.mxu1 %v825_v0  ;;  %654 = vmatprep.mubr.msk.f32.mxu1 %vm826_vm0, %v827_v1  ;;  %v212_v3 = vld [vmem:[#allocation5 + $0x8] sm:$0xff]  ;;  %v69_v4 = vld [vmem:[#allocation7] sm:$0xff]  ;;  %vm80_vm1 = vcmask 261120   ;;  %v213_v7 = vld [vmem:[#allocation5 + $0x10] sm:$0xff]  ;;  %vm226_vm2 = vcmask 1041409   ;;  %vm228_vm3 = vcmask 1042434  }
  0x39   :  { %v666_v5 = vpack.c.bf16 %v212_v3, %v211_v2  ;;  %v70_v6 = vld [vmem:[#allocation7 + $0x8] sm:$0xff]  ;;  %v214_v8 = vld [vmem:[#allocation5 + $0x18] sm:$0xff]  ;;  %v71_v10 = vld [vmem:[#allocation7 + $0x10] sm:$0xff]  ;;  %vm230_vm4 = vcmask 1043459   ;;  %v828_v54 = vmov 1966171168  }
  0x3a   :  { %v657_v9 = vpack.c.bf16 %v70_v6, %v69_v4  ;;  %v72_v11 = vld [vmem:[#allocation7 + $0x18] sm:$0xff]  ;;  %v65_v12 = vld [vmem:[#allocation2] sm:$0xff]  ;;  %v669_v13 = vpack.c.bf16 %v214_v8, %v213_v7  ;;  %v66_v15 = vld [vmem:[#allocation2 + $0x8] sm:$0xff]  ;;  %v306_v55 = vunpack.c.l.s4 %v828_v54  ;;  %v932_v60 = vshrl.u32 %v308_v56, 7 }
  0x3b   :  { %667 = vmatpush3.bf16.msra.mxu1 %v666_v5  ;;  %v661_v14 = vpack.c.bf16 %v72_v11, %v71_v10  ;;  %v67_v16 = vld [vmem:[#allocation2 + $0x10] sm:$0xff]  ;;  %v68_v17 = vld [vmem:[#allocation2 + $0x18] sm:$0xff]  ;;  %v178_v18 = vsel %vm80_vm1, %v65_v12, 0.0  ;;  %640 = vmatprep.mubr.msk.f32.mxu0 %vm80_vm1, %v65_v12  ;;  %v185_v20 = vsel %vm80_vm1, %v66_v15, 0.0  ;;  %v617_v62 = vld [vmem:[%s1034_s3] ss:$0 sm:$0xff] }
  0x3c   :  { %658 = vmatprep.subr.bf16.mxu0 %v657_v9  ;;  %668 = vmatprep.subr.bf16.mxu1 %v825_v0  ;;  %v179_v19 = vrot.slane %v178_v18, 4  ;;  %v192_v21 = vsel %vm80_vm1, %v67_v16, 0.0  ;;  %v199_v22 = vsel %vm80_vm1, %v68_v17, 0.0  ;;  %v186_v23 = vrot.slane %v185_v20, 4  ;;  %v612_v4 = vld [vmem:[%s1035_s4] ss:$0 sm:$0xff] }
  0x3d   :  { %660 = vmatpush3.bf16.msra.mxu0 %v657_v9  ;;  %v193_v24 = vrot.slane %v192_v21, 4  ;;  %v200_v25 = vrot.slane %v199_v22, 4  ;;  %v307_v59 = vunpack.c.0.s8 %v306_v55  ;;  %v942_v5 = vsub.s32 0, %v932_v60  ;;  %s830_s3 = smov [#allocation9]  }
  0x3e   :  { %662 = vmatprep.subr.bf16.mxu0 %v661_v14  ;;  %v180_v26 = vadd.f32 %v179_v19, %v178_v18  ;;  %v187_v27 = vadd.f32 %v186_v23, %v185_v20  ;;  %vm391_vm5 = vcmask 60416   ;;  %vm520_vm6 = vcmask 523520   ;;  %s598_s4 = sshll.u32 %s830_s3, 4  ;;  %s599_s4 = int_to_ptr.vmem [resolvable:$true] %s598_s4 }
  0x3f   :  { %670 = vmatpush3.bf16.msra.mxu1 %v669_v13  ;;  %v194_v28 = vadd.f32 %v193_v24, %v192_v21  ;;  %v201_v29 = vadd.f32 %v200_v25, %v199_v22  ;;  %v310_v63 = vsub.s32 %v307_v59, %v932_v60  ;;  %s768_s12 = scalar_lea.vmem %s599_s4, 64  ;;  %p773_p11 = scmp.lt.s32.totalorder %s599_s4, %s599_s4 }
  0x40   :  { %v181_v30 = vrot.slane %v180_v26, 2  ;;  %v188_v31 = vrot.slane %v187_v27, 2  ;;  %p769_p10 = scmp.ne.s32.totalorder %s599_s4, %s768_s12  ;;  %p774_p12 = scmp.lt.s32.totalorder %s768_s12, %s768_s12 }
  0x41   :  { %664 = vmatpush3.bf16.msra.mxu0 %v661_v14  ;;  %v195_v32 = vrot.slane %v194_v28, 2  ;;  %v202_v33 = vrot.slane %v201_v29, 2 }
  0x42   :  { %v182_v34 = vadd.f32 %v181_v30, %v180_v26  ;;  %v189_v35 = vadd.f32 %v188_v31, %v187_v27  ;;  %v370_v27 = vand.u32 127, %v308_v56  ;;  %p775_p13 = por %p774_p12, %p773_p11 }
  0x43   :  { %v196_v36 = vadd.f32 %v195_v32, %v194_v28  ;;  %v203_v37 = vadd.f32 %v202_v33, %v201_v29 }
  0x44   :  { %v183_v38 = vrot.slane %v182_v34, 1  ;;  %641 = vmatmul.mubr.msk.f32.vlgmr.msra.gmra.mrb[0].mxu0 %vm80_vm1, %v66_v15  ;;  %v190_v39 = vrot.slane %v189_v35, 1  ;;  %v965_v29 = vsub.s32 %v370_v27, %v932_v60  ;;  %p776_p0 = pnand %p775_p13, %p769_p10 }
  0x45   :  { %v197_v40 = vrot.slane %v196_v36, 1  ;;  %v204_v41 = vrot.slane %v203_v37, 1  ;;  %643 = vmatprep.mubr.msk.f32.mxu0 %vm80_vm1, %v67_v16 }
  0x46   :  { %v184_v42 = vadd.f32 %v183_v38, %v182_v34  ;;  %v191_v43 = vadd.f32 %v190_v39, %v189_v35 }
  0x47   :  { %v198_v44 = vadd.f32 %v197_v40, %v196_v36  ;;  %v205_v45 = vadd.f32 %v204_v41, %v203_v37  ;;  %v829_v41 = vmov 0  }
  0x48   :  { %v207_v46 = vmul.f32 0.125, %v184_v42  ;;  %644 = vmatmul.mubr.msk.f32.gmra.mrb[2].mxu0 %vm80_vm1, %v68_v17  ;;  %v208_v47 = vmul.f32 0.125, %v191_v43  ;;  %685 = vset.pattern.permute.xlu0 %v829_v41  ;;  %v402_v42 = vsub.s32 1, %v932_v60  ;;  %v406_v43 = vsub.s32 2, %v932_v60 }
  0x49   :  { %v209_v48 = vmul.f32 0.125, %v198_v44  ;;  %v210_v49 = vmul.f32 0.125, %v205_v45  ;;  %684 = vset.pattern.permute.xlu1 %v829_v41  ;;  %v410_v44 = vsub.s32 3, %v932_v60 }
  0x4a   :  { %v227_v50 = vsel %vm226_vm2, %v208_v47, %v207_v46 }
  0x4b   :  { %v229_v51 = vsel %vm228_vm3, %v209_v48, %v227_v50 }
  0x4c   :  { %v231_v52 = vsel %vm230_vm4, %v210_v49, %v229_v51 }
  0x4d   :  { %655 = vmatmul.mubr.msk.f32.vlgmr.msra.gmra.mrb[0].mxu1 %vm80_vm1, %v231_v52 }
 0x117   :  { %v642_v53 = vpop.f32.mrb[0].mxu0 }
 0x118   :  { %v159_v57 = vpop.f32.mrb[1].mxu0  ;;  %v949_v13 = vadd.f32 %v642_v53, %v612_v4 }
 0x119   :  { %v944_v8 = vadd.f32 %v612_v4, %v159_v57 }
 0x11b   :  { %v645_v58 = vpop.f32.mrb[2].mxu0 }
 0x11c   :  { %v169_v61 = vpop.f32.mrb[3].mxu0  ;;  %v954_v18 = vadd.f32 %v645_v58, %v612_v4 }
 0x11d   :  { %v946_v9 = vadd.f32 %v612_v4, %v169_v61 }
 0x120   :  { %v300_v0 = vpop.f32.mrb[0].mxu1 }
 0x121   :  { %v301_v1 = vadd.f32 %v617_v62, %v300_v0  ;;  %v656_v2 = vpop.f32.mrb[1].mxu1 }
 0x123   :  { %v311_v3 = vrot.slane %v301_v1, %v310_v63 }
 0x125   :  { %v312_v6 = vcombine.high %v311_v3, %v311_v3  ;;  %v319_v7 = vrot.slane %v311_v3, %v310_v63 }
 0x127   :  { %v332_v10 = vrot.slane %v319_v7, %v942_v5  ;;  %v327_v11 = vcombine.high %v319_v7, %v319_v7  ;;  %v326_v12 = vrot.slane %v312_v6, %v310_v63 }
 0x129   :  { %v349_v14 = vmul.f32 %v332_v10, %v944_v8  ;;  %v340_v15 = vrot.slane %v327_v11, %v942_v5  ;;  %v336_v16 = vrot.slane %v326_v12, %v942_v5  ;;  %v328_v17 = vcombine.high %v326_v12, %v326_v12 }
 0x12b   :  { %v353_v19 = vsel %vm80_vm1, %v349_v14, 0.0  ;;  %v351_v20 = vmul.f32 %v340_v15, %v946_v9  ;;  %v350_v21 = vmul.f32 %v336_v16, %v949_v13  ;;  %v344_v22 = vrot.slane %v328_v17, %v942_v5 }
 0x12c   :  { %354 = vadd.xlane.f32.xlu0 %v353_v19 }
 0x12d   :  { %v359_v23 = vsel %vm80_vm1, %v351_v20, 0.0  ;;  %v352_v24 = vmul.f32 %v344_v22, %v954_v18  ;;  %v356_v25 = vsel %vm80_vm1, %v350_v21, 0.0 }
 0x12e   :  { %360 = vadd.xlane.f32.xlu1 %v359_v23 }
 0x12f   :  { %v362_v26 = vsel %vm80_vm1, %v352_v24, 0.0 }
 0x130   :  { %357 = vadd.xlane.f32.xlu0 %v356_v25 }
 0x132   :  { %363 = vadd.xlane.f32.xlu1 %v362_v26 }
 0x1b9   :  { %v355_v28 = vpop.xlane.xlu0 %354 }
 0x1ba   :  { %v374_v32 = vrot.slane %v355_v28, %v965_v29 }
 0x1bb   :  { %v361_v30 = vpop.xlane.xlu1 %360 }
 0x1bc   :  { %v382_v34 = vrot.slane %v361_v30, %v965_v29 }
 0x1bd   :  { %v358_v31 = vpop.xlane.xlu0 %357 }
 0x1be   :  { %v378_v33 = vrot.slane %v358_v31, %v965_v29 }
 0x1bf   :  { %v364_v35 = vpop.xlane.xlu1 %363 }
 0x1c0   :  { %v386_v36 = vrot.slane %v364_v35, %v965_v29  ;;  %v387_v37 = vsel %vm226_vm2, %v378_v33, %v374_v32 }
 0x1c1   :  { %v388_v38 = vsel %vm228_vm3, %v382_v34, %v387_v37 }
 0x1c2   :  { %v389_v39 = vsel %vm230_vm4, %v386_v36, %v388_v38 }
 0x1c3   :  { %v392_v40 = vsel %vm391_vm5, %v389_v39, -inf }
 0x1c4   :  { %393 = vmax.xlane.f32.xlu0 %v392_v40 }
 0x251   :  { %v394_v45 = vpop.xlane.xlu0 %393 }
 0x252   :  { %v399_v46 = vrot.slane %v394_v45, %v942_v5  ;;  %v403_v47 = vrot.slane %v394_v45, %v402_v42  ;;  %v407_v48 = vrot.slane %v394_v45, %v406_v43  ;;  %v411_v49 = vrot.slane %v394_v45, %v410_v44 }
 0x254   :  { %v416_v50 = vsub.f32 %v355_v28, %v399_v46  ;;  %v417_v51 = vsub.f32 %v358_v31, %v403_v47  ;;  %v418_v52 = vsub.f32 %v361_v30, %v407_v48  ;;  %v419_v55 = vsub.f32 %v364_v35, %v411_v49 }
 0x256   :  { %v420_v53 = vmul.f32 1.442695, %v416_v50  ;;  %v422_v54 = vmul.f32 1.442695, %v417_v51  ;;  %v424_v56 = vmul.f32 1.442695, %v418_v52 }
 0x257   :  { %v426_v57 = vmul.f32 1.442695, %v419_v55 }
 0x258   :  { %686 = vpow2.f32 %v420_v53 }
 0x259   :  { %688 = vpow2.f32 %v422_v54 }
 0x25a   :  { %690 = vpow2.f32 %v424_v56 }
 0x25b   :  { %692 = vpow2.f32 %v426_v57 }
 0x262   :  { %v687_v58 = vpop.eup %686 }
 0x263   :  { %v689_v59 = vpop.eup %688  ;;  %433 = vperm.xlu1 %684, %v687_v58  }
 0x264   :  { %436 = vperm.xlu0 %685, %v689_v59   ;;  %v691_v60 = vpop.eup %690 }
 0x265   :  { %v693_v61 = vpop.eup %692 }
 0x267   :  { %439 = vperm.xlu1 %684, %v691_v60  }
 0x26b   :  { %442 = vperm.xlu1 %684, %v693_v61  }
 0x2e2   :  { %v434_v62 = vpop.permute.xlu1 %433 }
 0x2e3   :  { %v437_v63 = vpop.permute.xlu0 %436  ;;  %v447_v2 = vrot.slane %v434_v62, %v965_v29 }
 0x2e4   :  { %v451_v1 = vrot.slane %v437_v63, %v965_v29 }
 0x2e6   :  { %v440_v0 = vpop.permute.xlu1 %439  ;;  %v460_v6 = vsel %vm226_vm2, %v451_v1, %v447_v2 }
 0x2e7   :  { %v455_v3 = vrot.slane %v440_v0, %v965_v29 }
 0x2e9   :  { %v461_v10 = vsel %vm228_vm3, %v455_v3, %v460_v6 }
 0x2ea   :  { %v443_v4 = vpop.permute.xlu1 %442 }
 0x2eb   :  { %v459_v7 = vrot.slane %v443_v4, %v965_v29 }
 0x2ed   :  { %v462_v11 = vsel %vm230_vm4, %v459_v7, %v461_v10 }
 0x2ee   :  { %v464_v12 = vsel %vm391_vm5, %v462_v11, 0.0 }
 0x2ef   :  { %465 = vadd.xlane.f32.xlu1 %v464_v12 }
 0x37c   :  { %v466_v14 = vpop.xlane.xlu1 %465 }
 0x37d   :  { %v471_v15 = vrot.slane %v466_v14, %v942_v5  ;;  %v475_v16 = vrot.slane %v466_v14, %v402_v42  ;;  %v479_v17 = vrot.slane %v466_v14, %v406_v43  ;;  %v483_v19 = vrot.slane %v466_v14, %v410_v44 }
 0x37f   :  { %694 = vrcp.f32 %v471_v15 }
 0x380   :  { %696 = vrcp.f32 %v475_v16 }
 0x381   :  { %698 = vrcp.f32 %v479_v17 }
 0x382   :  { %700 = vrcp.f32 %v483_v19 }
 0x389   :  { %v695_v20 = vpop.eup %694 }
 0x38a   :  { %v489_v21 = vmul.f32 %v695_v20, %v687_v58  ;;  %v697_v22 = vpop.eup %696 }
 0x38b   :  { %v491_v23 = vmul.f32 %v697_v22, %v689_v59  ;;  %v699_v24 = vpop.eup %698 }
 0x38c   :  { %498 = vperm.xlu0 %685, %v489_v21   ;;  %v493_v25 = vmul.f32 %v699_v24, %v691_v60  ;;  %v701_v26 = vpop.eup %700 }
 0x38d   :  { %v495_v27 = vmul.f32 %v701_v26, %v693_v61 }
 0x390   :  { %503 = vperm.xlu0 %685, %v491_v23  }
 0x394   :  { %508 = vperm.xlu0 %685, %v493_v25  }
 0x398   :  { %513 = vperm.xlu0 %685, %v495_v27  }
 0x40b   :  { %v499_v5 = vpop.permute.xlu0 %498 }
 0x40c   :  { %v516_v28 = vmul.f32 %v499_v5, %v944_v8  ;;  %v564_v8 = vrot.slane %v499_v5, %v965_v29 }
 0x40e   :  { %v521_v30 = vsel %vm520_vm6, %v516_v28, 0.0 }
 0x40f   :  { %v522_v31 = vrot.slane %v521_v30, 4  ;;  %v504_v32 = vpop.permute.xlu0 %503 }
 0x410   :  { %v517_v33 = vmul.f32 %v504_v32, %v949_v13  ;;  %v568_v38 = vrot.slane %v504_v32, %v965_v29 }
 0x411   :  { %v523_v35 = vadd.f32 %v522_v31, %v521_v30 }
 0x412   :  { %v528_v34 = vsel %vm520_vm6, %v517_v33, 0.0  ;;  %v577_v46 = vsel %vm226_vm2, %v568_v38, %v564_v8 }
 0x413   :  { %v529_v36 = vrot.slane %v528_v34, 4  ;;  %v509_v37 = vpop.permute.xlu0 %508  ;;  %v524_v43 = vrot.slane %v523_v35, 2 }
 0x414   :  { %v518_v39 = vmul.f32 %v509_v37, %v946_v9  ;;  %v572_v41 = vrot.slane %v509_v37, %v965_v29 }
 0x415   :  { %v530_v40 = vadd.f32 %v529_v36, %v528_v34  ;;  %v525_v53 = vadd.f32 %v524_v43, %v523_v35 }
 0x416   :  { %v535_v42 = vsel %vm520_vm6, %v518_v39, 0.0  ;;  %v578_v9 = vsel %vm228_vm3, %v572_v41, %v577_v46 }
 0x417   :  { %v531_v44 = vrot.slane %v530_v40, 2  ;;  %v536_v45 = vrot.slane %v535_v42, 4  ;;  %v514_v13 = vpop.permute.xlu0 %513 }
 0x418   :  { %v519_v47 = vmul.f32 %v514_v13, %v954_v18  ;;  %v576_v48 = vrot.slane %v514_v13, %v965_v29  ;;  %v526_v18 = vrot.slane %v525_v53, 1 }
 0x419   :  { %v532_v49 = vadd.f32 %v531_v44, %v530_v40  ;;  %v537_v50 = vadd.f32 %v536_v45, %v535_v42 }
 0x41a   :  { %v542_v51 = vsel %vm520_vm6, %v519_v47, 0.0  ;;  %v579_v52 = vsel %vm230_vm4, %v576_v48, %v578_v9 }
 0x41b   :  { %v538_v54 = vrot.slane %v537_v50, 2  ;;  %v543_v55 = vrot.slane %v542_v51, 4  ;;  %581 = vst.msk [vmem:[#allocation9] sm:$0xf] %vm391_vm5, %v579_v52  ;;  %v533_v56 = vrot.slane %v532_v49, 1 }
 0x41d   :  { %v539_v57 = vadd.f32 %v538_v54, %v537_v50  ;;  %v544_v58 = vadd.f32 %v543_v55, %v542_v51 }
 0x41f   :  { %v540_v29 = vrot.slane %v539_v57, 1  ;;  %v545_v59 = vrot.slane %v544_v58, 2 }
 0x420   :  { %779 = shalt.err (!%p776_p0)
}
 0x421   :  { %s780_s15 = scalar_lea.hbm %s1037_s6, 64 }
 0x422   :  { %p781_p1 = scmp.ne.s32.totalorder %s1037_s6, %s780_s15  ;;  %p784_p2 = scmp.lt.u32.totalorder %s780_s15, %s1037_s6 }
 0x424   :  { %p786_p3 = pnand %p784_p2, %p781_p1 }
 0x426   :  { %789 = shalt.err (!%p786_p3)
}
 0x427   :  { %601 = dma.vmem_to_hbm [thread:$0]  %s599_s4, 64, %s1037_s6, [#allocation10]   ;;  %v534_v60 = vadd.f32 %v533_v56, %v532_v49  ;;  %v546_v61 = vadd.f32 %v545_v59, %v544_v58  ;;  %v541_v62 = vadd.f32 %v540_v29, %v539_v57  ;;  %v527_v63 = vadd.f32 %v526_v18, %v525_v53 }
 0x428   :  { %s831_s21 = smov 96   ;;  %s832_s22 = smov [#allocation8]   ;;  %vm559_vm7 = vcmask 257024  }
 0x429   :  { %v547_v0 = vrot.slane %v546_v61, 1  ;;  %v553_v2 = vsel %vm226_vm2, %v534_v60, %v527_v63  ;;  %s588_s23 = sshll.u32 %s832_s22, 4  ;;  %s589_s23 = int_to_ptr.vmem [resolvable:$true] %s588_s23 }
 0x42a   :  { %v554_v3 = vsel %vm228_vm3, %v541_v62, %v553_v2  ;;  %s790_s6 = scalar_lea.vmem %s589_s23, 64  ;;  %p795_p5 = scmp.lt.s32.totalorder %s589_s23, %s589_s23 }
 0x42b   :  { %v548_v1 = vadd.f32 %v547_v0, %v546_v61  ;;  %p791_p4 = scmp.ne.s32.totalorder %s589_s23, %s790_s6  ;;  %p796_p6 = scmp.lt.s32.totalorder %s790_s6, %s790_s6 }
 0x42d   :  { %v555_v4 = vsel %vm230_vm4, %v548_v1, %v554_v3  ;;  %p797_p7 = por %p796_p6, %p795_p5 }
 0x42e   :  { %556 = vrot.lane.b32.xlu1 %v555_v4, %s831_s21 }
 0x42f   :  { %p798_p8 = pnand %p797_p7, %p791_p4 }
 0x4a0   :  { %v557_v6 = vpop.permute.xlu1 %556 }
 0x4a1   :  { %560 = vst.msk [vmem:[#allocation8] sm:$0xf] %vm559_vm7, %v557_v6 }
 0x4a2   :  { %801 = shalt.err (!%p798_p8)
}
 0x4a3   :  { %s802_s27 = scalar_lea.hbm %s1036_s5, 64 }
 0x4a4   :  { %p803_p9 = scmp.ne.s32.totalorder %s1036_s5, %s802_s27  ;;  %p806_p10 = scmp.lt.u32.totalorder %s802_s27, %s1036_s5 }
 0x4a6   :  { %p808_p11 = pnand %p806_p10, %p803_p9 }
 0x4a8   :  { %811 = shalt.err (!%p808_p11)
}
 0x4a9   :  { %591 = dma.vmem_to_hbm [thread:$0]  %s589_s23, 64, %s1036_s5, [#allocation4]  }
 0x4aa   :  { %816 = dma.done.wait [#allocation4], 64  }
 0x4ab   :  { %817 = vsyncadd [#allocation4], 4294967232 }
 0x4ac   :  { %818 = dma.done.wait [#allocation10], 64  }
 0x4ad   :  { %819 = vsyncadd [#allocation10], 4294967232 }
 0x4ae   :  { %608 = vsyncpa [#allocation3], 1 }
 0x4af   :  { %609 = vsyncpa [#allocation6], 1 }
 0x4b0   :  { %610 = vsyncpa [#allocation4], 1 }
 0x4b1   :  { %611 = vsyncpa [#allocation10], 1 }

</bundles_post_ra>
